<compile_context>
chip_gen: v5e
topology: v5e:2x2
jax: 0.10.0
libtpu: 0.0.40
codegen_flags: <defaults>
</compile_context>

<pallas_src>
import jax
import jax.numpy as jnp
from jax import lax
from jax.experimental import pallas as pl
from jax.experimental.pallas import tpu as pltpu

LN_EPS = 1e-12            # layer_norm_eps
_INV_SQRT2 = 0.7071067811865476


def _round_up(x, m):
    return (x + m - 1) // m * m


def _b_kernel(x_ref, w1_ref, b1_ref, gamma_ref, beta_ref, w2_ref, bias_ref,
              o_ref, h_ref):
    # ---- transform (dense + gelu + LayerNorm): once per row tile ----------
    # Correct because the vocab axis (program_id(1)) is the innermost,
    # sequential ("arbitrary") axis: j==0 runs before j>0 on the same core.
    @pl.when(pl.program_id(1) == 0)
    def _():
        # dense: x @ W1^T  (W1 is [out, in]; contract matching last dims,
        # bf16 operands, f32 accumulation)
        h = lax.dot_general(x_ref[...], w1_ref[...],
                            (((1,), (1,)), ((), ())),
                            preferred_element_type=jnp.float32)
        h = h + b1_ref[...].astype(jnp.float32)          # (1, H) broadcast

        # exact (erf) gelu — PyTorch F.gelu default — computed in f32 vregs
        h = 0.5 * h * (1.0 + lax.erf(h * _INV_SQRT2))

        # LayerNorm over last dim (biased variance), f32 math
        mean = jnp.mean(h, axis=-1, keepdims=True)
        cent = h - mean
        var = jnp.mean(cent * cent, axis=-1, keepdims=True)
        h = cent * lax.rsqrt(var + LN_EPS)
        h = (h * gamma_ref[...].astype(jnp.float32)
             + beta_ref[...].astype(jnp.float32))

        h_ref[...] = h.astype(h_ref.dtype)               # bf16 store -> MXU feed

    # ---- decoder: h @ W2_tile^T + bias_tile (per vocab tile) --------------
    out = lax.dot_general(h_ref[...], w2_ref[...],
                          (((1,), (1,)), ((), ())),
                          preferred_element_type=jnp.float32)
    out = out + bias_ref[...].astype(jnp.float32)        # (1, tn) broadcast
    o_ref[...] = out.astype(o_ref.dtype)


def b_forward(x, w1, b1, gamma, beta, w2, bias, *, tm=256, tn=None,
              compute_dtype=jnp.bfloat16,
              vmem_budget_bytes=48 * 1024 * 1024):
    """x: [batch, seq, H] -> [batch, seq, V].

    compute_dtype: dtype fed to the MXU (weights, x tile, h scratch).
    Accumulation and activation/LayerNorm math are always f32.
    """
    batch, seq, H = x.shape
    V = w2.shape[0]
    M = batch * seq

    out_dt = x.dtype
    cdt = jnp.dtype(compute_dtype)
    csz, osz = cdt.itemsize, jnp.dtype(out_dt).itemsize

    # ---- vocab tile: prefer a tile that divides V (no weight pad / slice) --
    tn_max = tn if tn is not None else (1024 if csz <= 2 else 512)
    tn_max = max(128, (tn_max // 128) * 128)
    if V <= tn_max:
        tn_eff, Vp = V, V                     # single full-width vocab tile
    else:
        tn_eff = 0
        t = tn_max
        while t >= 128:
            if V % t == 0:
                tn_eff = t
                break
            t -= 128
        if tn_eff == 0:                       # no clean divisor: pad once
            tn_eff = tn_max
        Vp = _round_up(V, tn_eff)

    # ---- row tile, clamped by VMEM working-set budget (v7x 64 MiB safe) ----
    tm_eff = min(tm, _round_up(M, 8))
    tm_eff = max(8, (tm_eff // 8) * 8)

    def ws_bytes(tm_, tn_):
        return (2 * H * H * csz               # W1 (double-buffered, const idx)
                + 2 * tn_ * H * csz           # W2 vocab tile
                + 2 * tm_ * H * csz           # x row tile
                + 2 * tm_ * tn_ * osz         # out tile
                + tm_ * H * csz               # h scratch
                + 8 * H * 4 + 2 * tn_ * 4)    # small f32 vectors

    while ws_bytes(tm_eff, tn_eff) > vmem_budget_bytes and tm_eff > 64:
        tm_eff = max(64, (tm_eff // 2 // 8) * 8)
    # TODO(synk): for H >= 2048-4096, K-tile the transform matmul (inner
    # pltpu.emit_pipeline accumulating into h_ref) so the (H, H) W1 block
    # need not be fully VMEM-resident.
    # TODO(synk): pipeline_mode=pl.Buffered(1) on the constant-index
    # W1/b1/gamma/beta specs would drop their second buffer; omitted here for
    # broad jax-version compatibility.

    Mp = _round_up(M, tm_eff)

    x2 = x.reshape(M, H).astype(cdt)
    if Mp != M:
        # Padded rows flow through LayerNorm of a constant row: centered
        # values are exactly 0, var+eps > 0, so no NaN/Inf; sliced away below.
        x2 = jnp.pad(x2, ((0, Mp - M), (0, 0)))

    w1c = w1.astype(cdt)
    w2c = w2.astype(cdt)
    if Vp != V:
        # NOTE: for a hot-loop LM head, pre-pad/pre-cast the decoder weight
        # once outside this wrapper to avoid a per-call pad copy.
        w2c = jnp.pad(w2c, ((0, Vp - V), (0, 0)))
        bias_p = jnp.pad(bias, (0, Vp - V))
    else:
        bias_p = bias

    b1_2 = b1.reshape(1, H)
    gamma_2 = gamma.reshape(1, H)
    beta_2 = beta.reshape(1, H)
    bias_2 = bias_p.reshape(1, Vp)

    grid = (Mp // tm_eff, Vp // tn_eff)

    # W2 is re-streamed once per row tile; W1 / x / logits move once.
    cost = pl.CostEstimate(
        flops=2 * Mp * H * H + 2 * Mp * H * Vp,
        transcendentals=Mp * H,
        bytes_accessed=(Mp * H * csz
                        + H * H * csz
                        + (Mp // tm_eff) * Vp * H * csz
                        + Mp * Vp * osz
                        + 4 * (3 * H + Vp)),
    )

    vmem_limit = int(min(max(ws_bytes(tm_eff, tn_eff) * 5 // 4 + (2 << 20),
                             32 << 20), 96 << 20))

    out = pl.pallas_call(
        _b_kernel,
        out_shape=jax.ShapeDtypeStruct((Mp, Vp), out_dt),
        grid_spec=pltpu.PrefetchScalarGridSpec(
            num_scalar_prefetch=0,
            grid=grid,
            in_specs=[
                pl.BlockSpec((tm_eff, H), lambda i, j: (i, 0)),   # x rows
                pl.BlockSpec((H, H), lambda i, j: (0, 0)),        # W1 [out,in]
                pl.BlockSpec((1, H), lambda i, j: (0, 0)),        # b1
                pl.BlockSpec((1, H), lambda i, j: (0, 0)),        # LN gamma
                pl.BlockSpec((1, H), lambda i, j: (0, 0)),        # LN beta
                pl.BlockSpec((tn_eff, H), lambda i, j: (j, 0)),   # W2 vocab tile
                pl.BlockSpec((1, tn_eff), lambda i, j: (0, j)),   # decoder bias
            ],
            out_specs=pl.BlockSpec((tm_eff, tn_eff), lambda i, j: (i, j)),
            scratch_shapes=[pltpu.VMEM((tm_eff, H), cdt)],        # cached h
        ),
        compiler_params=pltpu.CompilerParams(
            dimension_semantics=("parallel", "arbitrary"),
            vmem_limit_bytes=vmem_limit),
        cost_estimate=cost,
    )(x2, w1c, b1_2, gamma_2, beta_2, w2c, bias_2)

    if Mp != M or Vp != V:
        out = out[:M, :V]
    return out.reshape(batch, seq, V)


def _init_params(key, hidden_size, vocab_size):
    k1, k2, k3 = jax.random.split(key, 3)
    lim1 = 1.0 / jnp.sqrt(hidden_size)
    w1 = jax.random.uniform(k1, (hidden_size, hidden_size),
                            jnp.float32, -lim1, lim1)      # dense.weight [out,in]
    b1 = jax.random.uniform(k2, (hidden_size,), jnp.float32, -lim1, lim1)
    gamma = jnp.ones((hidden_size,), jnp.float32)          # LayerNorm.weight
    beta = jnp.zeros((hidden_size,), jnp.float32)          # LayerNorm.bias
    w2 = jax.random.uniform(k3, (vocab_size, hidden_size),
                            jnp.float32, -lim1, lim1)      # decoder.weight
    bias = jnp.zeros((vocab_size,), jnp.float32)           # B.bias (zeros init)
    return w1, b1, gamma, beta, w2, bias


if __name__ == "__main__":
    batch, seq, hidden_size, vocab_size = 2, 8, 32, 64

    key = jax.random.PRNGKey(0)
    kx, kp = jax.random.split(key)
    x = jax.random.normal(kx, (batch, seq, hidden_size), jnp.float32)
    params = _init_params(kp, hidden_size, vocab_size)
    w1, b1, gamma, beta, w2, bias = params

    # plain-JAX reference (f32 throughout)
    h = x @ w1.T + b1
    h = 0.5 * h * (1.0 + lax.erf(h / jnp.sqrt(2.0)))
    mu = h.mean(-1, keepdims=True)
    var = ((h - mu) ** 2).mean(-1, keepdims=True)
    ref = ((h - mu) / jnp.sqrt(var + LN_EPS) * gamma + beta) @ w2.T + bias

    # exact f32 path: tight numerics check against the reference
    out_f32 = b_forward(x, *params, compute_dtype=jnp.float32)
    jax.block_until_ready(out_f32)
    assert out_f32.shape == (batch, seq, vocab_size)
    assert jnp.max(jnp.abs(out_f32 - ref)) < 1e-4

    # default fast path: bf16 MXU feed, f32 accumulation / activation math
    out_bf16 = b_forward(x, *params)
    jax.block_until_ready(out_bf16)
    assert out_bf16.shape == (batch, seq, vocab_size)
    assert jnp.max(jnp.abs(out_bf16 - ref)) < 1e-1

    print("KERNEL_OK")
</pallas_src>

<mosaic_0001>
module attributes {stable_mosaic.version = 11 : i64} {
  func.func @_b_kernel(%arg0: i32, %arg1: i32, %arg2: memref<16x32xf32, #tpu.memory_space<vmem>>, %arg3: memref<32x32xf32, #tpu.memory_space<vmem>>, %arg4: memref<1x32xf32, #tpu.memory_space<vmem>>, %arg5: memref<1x32xf32, #tpu.memory_space<vmem>>, %arg6: memref<1x32xf32, #tpu.memory_space<vmem>>, %arg7: memref<64x32xf32, #tpu.memory_space<vmem>>, %arg8: memref<1x64xf32, #tpu.memory_space<vmem>>, %arg9: memref<16x64xf32, #tpu.memory_space<vmem>>, %arg10: memref<16x32xf32, #tpu.memory_space<vmem>>) attributes {dimension_semantics = [#tpu.dimension_semantics<parallel>, #tpu.dimension_semantics<arbitrary>], iteration_bounds = array<i64: 1, 1>, scalar_prefetch = 0 : i64, scratch_operands = 1 : i64, tpu.core_type = #tpu.core_type<tc>, window_params = [{transform_indices = @transform_0, window_bounds = array<i64: 16, 32>}, {pipeline_mode = #tpu.pipeline_mode<synchronous>, transform_indices = @transform_1, window_bounds = array<i64: 32, 32>}, {pipeline_mode = #tpu.pipeline_mode<synchronous>, transform_indices = @transform_2, window_bounds = array<i64: 1, 32>}, {pipeline_mode = #tpu.pipeline_mode<synchronous>, transform_indices = @transform_3, window_bounds = array<i64: 1, 32>}, {pipeline_mode = #tpu.pipeline_mode<synchronous>, transform_indices = @transform_4, window_bounds = array<i64: 1, 32>}, {transform_indices = @transform_5, window_bounds = array<i64: 64, 32>}, {transform_indices = @transform_6, window_bounds = array<i64: 1, 64>}, {transform_indices = @transform_7, window_bounds = array<i64: 16, 64>}]} {
    %c0_i32 = arith.constant 0 : i32
    %0 = arith.cmpi eq, %arg1, %c0_i32 : i32
    %1 = arith.extui %0 : i1 to i32
    %c0_i32_0 = arith.constant 0 : i32
    %2 = arith.cmpi ne, %1, %c0_i32_0 : i32
    scf.if %2 {
      %c0_8 = arith.constant 0 : index
      %c0_9 = arith.constant 0 : index
      %10 = vector.load %arg2[%c0_8, %c0_9] : memref<16x32xf32, #tpu.memory_space<vmem>>, vector<16x32xf32>
      %c0_10 = arith.constant 0 : index
      %c0_11 = arith.constant 0 : index
      %11 = vector.load %arg3[%c0_10, %c0_11] : memref<32x32xf32, #tpu.memory_space<vmem>>, vector<32x32xf32>
      %cst_12 = arith.constant dense<0.000000e+00> : vector<16x32xf32>
      %12 = tpu.matmul %10, %11, %cst_12 {dimension_numbers = #tpu.dot_dimension_numbers<[1], [1], [0], [0], [0, 0, 1, 0], [], []>} : vector<16x32xf32>, vector<32x32xf32>, vector<16x32xf32> -> vector<16x32xf32>
      %c0_13 = arith.constant 0 : index
      %c0_14 = arith.constant 0 : index
      %13 = vector.load %arg4[%c0_13, %c0_14] : memref<1x32xf32, #tpu.memory_space<vmem>>, vector<1x32xf32>
      %14 = vector.broadcast %13 : vector<1x32xf32> to vector<16x32xf32>
      %15 = arith.addf %12, %14 : vector<16x32xf32>
      %cst_15 = arith.constant 5.000000e-01 : f32
      %16 = vector.broadcast %cst_15 : f32 to vector<16x32xf32>
      %17 = arith.mulf %16, %15 : vector<16x32xf32>
      %cst_16 = arith.constant 0.707106769 : f32
      %18 = vector.broadcast %cst_16 : f32 to vector<16x32xf32>
      %19 = arith.mulf %15, %18 : vector<16x32xf32>
      %20 = math.erf %19 : vector<16x32xf32>
      %cst_17 = arith.constant 1.000000e+00 : f32
      %21 = vector.broadcast %cst_17 : f32 to vector<16x32xf32>
      %22 = arith.addf %21, %20 : vector<16x32xf32>
      %23 = arith.mulf %17, %22 : vector<16x32xf32>
      %cst_18 = arith.constant dense<0.000000e+00> : vector<16xf32>
      %24 = vector.multi_reduction <add>, %23, %cst_18 [1] : vector<16x32xf32> to vector<16xf32>
      %25 = vector.shape_cast %24 : vector<16xf32> to vector<16x1xf32>
      %cst_19 = arith.constant 3.200000e+01 : f32
      %26 = vector.broadcast %cst_19 : f32 to vector<16x1xf32>
      %27 = arith.divf %25, %26 : vector<16x1xf32>
      %28 = vector.broadcast %27 : vector<16x1xf32> to vector<16x32xf32>
      %29 = arith.subf %23, %28 : vector<16x32xf32>
      %30 = arith.mulf %29, %29 : vector<16x32xf32>
      %cst_20 = arith.constant dense<0.000000e+00> : vector<16xf32>
      %31 = vector.multi_reduction <add>, %30, %cst_20 [1] : vector<16x32xf32> to vector<16xf32>
      %32 = vector.shape_cast %31 : vector<16xf32> to vector<16x1xf32>
      %cst_21 = arith.constant 3.200000e+01 : f32
      %33 = vector.broadcast %cst_21 : f32 to vector<16x1xf32>
      %34 = arith.divf %32, %33 : vector<16x1xf32>
      %cst_22 = arith.constant 9.99999996E-13 : f32
      %35 = vector.broadcast %cst_22 : f32 to vector<16x1xf32>
      %36 = arith.addf %34, %35 : vector<16x1xf32>
      %37 = math.rsqrt %36 : vector<16x1xf32>
      %38 = vector.broadcast %37 : vector<16x1xf32> to vector<16x32xf32>
      %39 = arith.mulf %29, %38 : vector<16x32xf32>
      %c0_23 = arith.constant 0 : index
      %c0_24 = arith.constant 0 : index
      %40 = vector.load %arg5[%c0_23, %c0_24] : memref<1x32xf32, #tpu.memory_space<vmem>>, vector<1x32xf32>
      %41 = vector.broadcast %40 : vector<1x32xf32> to vector<16x32xf32>
      %42 = arith.mulf %39, %41 : vector<16x32xf32>
      %c0_25 = arith.constant 0 : index
      %c0_26 = arith.constant 0 : index
      %43 = vector.load %arg6[%c0_25, %c0_26] : memref<1x32xf32, #tpu.memory_space<vmem>>, vector<1x32xf32>
      %44 = vector.broadcast %43 : vector<1x32xf32> to vector<16x32xf32>
      %45 = arith.addf %42, %44 : vector<16x32xf32>
      %c0_27 = arith.constant 0 : index
      %c0_28 = arith.constant 0 : index
      %46 = vector.load %arg10[%c0_27, %c0_28] : memref<16x32xf32, #tpu.memory_space<vmem>>, vector<16x32xf32>
      tpu.vector_store %arg10[%c0_27, %c0_28], %45 {strides = array<i32>} : memref<16x32xf32, #tpu.memory_space<vmem>>, vector<16x32xf32>,
    } else {
    }
    %c0 = arith.constant 0 : index
    %c0_1 = arith.constant 0 : index
    %3 = vector.load %arg10[%c0, %c0_1] : memref<16x32xf32, #tpu.memory_space<vmem>>, vector<16x32xf32>
    %c0_2 = arith.constant 0 : index
    %c0_3 = arith.constant 0 : index
    %4 = vector.load %arg7[%c0_2, %c0_3] : memref<64x32xf32, #tpu.memory_space<vmem>>, vector<64x32xf32>
    %cst = arith.constant dense<0.000000e+00> : vector<16x64xf32>
    %5 = tpu.matmul %3, %4, %cst {dimension_numbers = #tpu.dot_dimension_numbers<[1], [1], [0], [0], [0, 0, 1, 0], [], []>} : vector<16x32xf32>, vector<64x32xf32>, vector<16x64xf32> -> vector<16x64xf32>
    %c0_4 = arith.constant 0 : index
    %c0_5 = arith.constant 0 : index
    %6 = vector.load %arg8[%c0_4, %c0_5] : memref<1x64xf32, #tpu.memory_space<vmem>>, vector<1x64xf32>
    %7 = vector.broadcast %6 : vector<1x64xf32> to vector<16x64xf32>
    %8 = arith.addf %5, %7 : vector<16x64xf32>
    %c0_6 = arith.constant 0 : index
    %c0_7 = arith.constant 0 : index
    %9 = vector.load %arg9[%c0_6, %c0_7] : memref<16x64xf32, #tpu.memory_space<vmem>>, vector<16x64xf32>
    tpu.vector_store %arg9[%c0_6, %c0_7], %8 {strides = array<i32>} : memref<16x64xf32, #tpu.memory_space<vmem>>, vector<16x64xf32>,
    return
  }
  func.func @transform_0(%arg0: i32, %arg1: i32) -> (i32, i32) {
    %c0_i32 = arith.constant 0 : i32
    %c0_i32_0 = arith.constant 0 : i32
    return %arg0, %c0_i32 : i32, i32
  }
  func.func @transform_1(%arg0: i32, %arg1: i32) -> (i32, i32) {
    %c0_i32 = arith.constant 0 : i32
    %c0_i32_0 = arith.constant 0 : i32
    %c0_i32_1 = arith.constant 0 : i32
    return %c0_i32, %c0_i32_0 : i32, i32
  }
  func.func @transform_2(%arg0: i32, %arg1: i32) -> (i32, i32) {
    %c0_i32 = arith.constant 0 : i32
    %c0_i32_0 = arith.constant 0 : i32
    %c0_i32_1 = arith.constant 0 : i32
    return %c0_i32, %c0_i32_0 : i32, i32
  }
  func.func @transform_3(%arg0: i32, %arg1: i32) -> (i32, i32) {
    %c0_i32 = arith.constant 0 : i32
    %c0_i32_0 = arith.constant 0 : i32
    %c0_i32_1 = arith.constant 0 : i32
    return %c0_i32, %c0_i32_0 : i32, i32
  }
  func.func @transform_4(%arg0: i32, %arg1: i32) -> (i32, i32) {
    %c0_i32 = arith.constant 0 : i32
    %c0_i32_0 = arith.constant 0 : i32
    %c0_i32_1 = arith.constant 0 : i32
    return %c0_i32, %c0_i32_0 : i32, i32
  }
  func.func @transform_5(%arg0: i32, %arg1: i32) -> (i32, i32) {
    %c0_i32 = arith.constant 0 : i32
    %c0_i32_0 = arith.constant 0 : i32
    return %arg1, %c0_i32 : i32, i32
  }
  func.func @transform_6(%arg0: i32, %arg1: i32) -> (i32, i32) {
    %c0_i32 = arith.constant 0 : i32
    %c0_i32_0 = arith.constant 0 : i32
    return %c0_i32, %arg1 : i32, i32
  }
  func.func @transform_7(%arg0: i32, %arg1: i32) -> (i32, i32) {
    %c0_i32 = arith.constant 0 : i32
    return %arg0, %arg1 : i32, i32
  }
}

</mosaic_0001>

<bundles_post_ra>
// kernel: tpu_custom_call.1
= control target key start
LH: loop header
LB: loop body
LE: loop exit
PB: predicated region body
PF: predicated region fallthrough
CT: control target
= control target key end

     0   :  { %vm41_vm0 = vcmask 261120   ;;  %s549_s0 = inlined_call_operand.vmem [shape: f32[16,32], index: 0, kind: input, shape index: {}]   ;;  %s550_s1 = inlined_call_operand.vmem [shape: f32[32,32], index: 1, kind: input, shape index: {}]   ;;  %s551_s2 = inlined_call_operand.vmem [shape: f32[1,32], index: 2, kind: input, shape index: {}]   ;;  %s552_s3 = inlined_call_operand.vmem [shape: f32[1,32], index: 3, kind: input, shape index: {}]   ;;  %s553_s4 = inlined_call_operand.vmem [shape: f32[1,32], index: 4, kind: input, shape index: {}]   ;;  %s554_s5 = inlined_call_operand.vmem [shape: f32[64,32], index: 5, kind: input, shape index: {}]   ;;  %s555_s6 = inlined_call_operand.vmem [shape: f32[1,64], index: 6, kind: input, shape index: {}]   ;;  %s556_s7 = inlined_call_operand.hbm [shape: f32[16,64], index: 7, kind: output, shape index: {}]  }
   0x1   :  { %v36_v0 = vld [vmem:[%s550_s1 + $0x18] sm:$0xff]  ;;  %v35_v1 = vld [vmem:[%s550_s1 + $0x10] sm:$0xff] }
   0x2   :  { %325 = vmatpush.xpose.msk.msra.mxu0 %vm41_vm0, %v36_v0 }
   0x3   :  { %12 = vsyncpa [#allocation4], 0  ;;  %v34_v2 = vld [vmem:[%s550_s1 + $0x8] sm:$0xff]  ;;  %v33_v3 = vld [vmem:[%s550_s1] sm:$0xff]  ;;  %s396_s8 = smov [#allocation3]   ;;  %s313_s12 = sshll.u32 %s556_s7, 4  ;;  %s314_s12 = int_to_ptr.hbm [resolvable:$true] %s313_s12 }
   0x4   :  { %v31_v4 = vld [vmem:[%s549_s0] sm:$0xff]  ;;  %v32_v5 = vld [vmem:[%s549_s0 + $0x8] sm:$0xff]  ;;  %s311_s9 = sshll.u32 %s396_s8, 4  ;;  %s397_s13 = smov 128   ;;  %s312_s9 = int_to_ptr.vmem [resolvable:$true] %s311_s9 }
   0x5   :  { %v355_v6 = vld [vmem:[%s551_s2] ss:$0 sm:$0xff]  ;;  %s398_s14 = smov 8  }
   0x6   :  { %326 = vmatpush.xpose.msk.msra.mxu0 %vm41_vm0, %v35_v1 }
   0xa   :  { %327 = vmatpush.xpose.msk.msra.mxu0 %vm41_vm0, %v34_v2 }
   0xe   :  { %328 = vmatpush.xpose.msk.msra.mxu0 %vm41_vm0, %v33_v3 }
  0x11   :  { %329 = vmatmul.msk.f32.vlgmr.msra.gmra.mxu0 %vm41_vm0, %v31_v4 }
  0x19   :  { %330 = vmatmul.msk.f32.gmra.mxu0 %vm41_vm0, %v32_v5 }
  0x8e   :  { %v77_v7 = vpop.f32.mrf.mxu0 }
  0x8f   :  { %v466_v8 = vadd.f32 %v355_v6, %v77_v7 }
  0x91   :  { %v469_v9 = vmul.f32 0.70710677, %v466_v8 }
  0x93   :  { %v87_v10 = vmul.f32 %v469_v9, %v469_v9 }
  0x95   :  { %v88_v11 = vmin.f32 %v87_v10, 16.0 }
  0x96   :  { %v80_v12 = vpop.f32.mrf.mxu0 }
  0x97   :  { %v473_v13 = vadd.f32 %v355_v6, %v80_v12  ;;  %v100_v14 = vmul.f32 3.8918573e-05, %v88_v11  ;;  %v89_v15 = vmul.f32 2.1237322e-06, %v88_v11 }
  0x99   :  { %v476_v16 = vmul.f32 0.70710677, %v473_v13  ;;  %v101_v17 = vadd.f32 0.001143296, %v100_v14  ;;  %v90_v20 = vadd.f32 0.00028619796, %v89_v15 }
  0x9b   :  { %v127_v18 = vmul.f32 %v476_v16, %v476_v16  ;;  %v102_v19 = vmul.f32 %v101_v17, %v88_v11  ;;  %v91_v26 = vmul.f32 %v90_v20, %v88_v11 }
  0x9d   :  { %v128_v21 = vmin.f32 %v127_v18, 16.0  ;;  %v103_v22 = vadd.f32 0.014752088, %v102_v19  ;;  %v92_v33 = vadd.f32 0.0036580483, %v91_v26 }
  0x9f   :  { %v129_v23 = vmul.f32 2.1237322e-06, %v128_v21  ;;  %v140_v24 = vmul.f32 3.8918573e-05, %v128_v21  ;;  %v104_v25 = vmul.f32 %v103_v22, %v88_v11  ;;  %v93_v39 = vmul.f32 %v92_v33, %v88_v11 }
  0xa0   :  { %v84_v22 = vmul.f32 0.5, %v473_v13 }
  0xa1   :  { %v130_v27 = vadd.f32 0.00028619796, %v129_v23  ;;  %v141_v28 = vadd.f32 0.001143296, %v140_v24  ;;  %v105_v29 = vadd.f32 0.112945676, %v104_v25 }
  0xa2   :  { %v94_v44 = vadd.f32 0.05243302, %v93_v39 }
  0xa3   :  { %v131_v30 = vmul.f32 %v130_v27, %v128_v21  ;;  %v142_v31 = vmul.f32 %v141_v28, %v128_v21  ;;  %v106_v32 = vmul.f32 %v105_v29, %v88_v11  ;;  %v83_v28 = vmul.f32 0.5, %v466_v8 }
  0xa4   :  { %v95_v48 = vmul.f32 %v94_v44, %v88_v11  ;;  %v395_v29 = vmov 32.0   ;;  %v245_v44 = vld [vmem:[%s554_s5 + $0x38] sm:$0xff] }
  0xa5   :  { %v132_v34 = vadd.f32 0.0036580483, %v131_v30  ;;  %v143_v35 = vadd.f32 0.014752088, %v142_v31  ;;  %v107_v36 = vadd.f32 0.4994258, %v106_v32  ;;  %343 = vmatpush.xpose.msk.msra.mxu2 %vm41_vm0, %v245_v44  ;;  %333 = vmatpush.xpose.msk.msra.mxu1 %vm41_vm0, %v245_v44 }
  0xa6   :  { %v96_v53 = vadd.f32 0.18741608, %v95_v48  ;;  %v241_v48 = vld [vmem:[%s554_s5 + $0x18] sm:$0xff] }
  0xa7   :  { %v144_v37 = vmul.f32 %v143_v35, %v128_v21  ;;  %v108_v38 = vmul.f32 %v107_v36, %v88_v11  ;;  %v133_v40 = vmul.f32 %v132_v34, %v128_v21 }
  0xa8   :  { %v97_v58 = vmul.f32 %v96_v53, %v88_v11 }
  0xa9   :  { %v145_v41 = vadd.f32 0.112945676, %v144_v37  ;;  %v109_v42 = vadd.f32 1.0, %v108_v38  ;;  %v134_v45 = vadd.f32 0.05243302, %v133_v40 }
  0xaa   :  { %v98_v1 = vadd.f32 1.1283791, %v97_v58 }
  0xab   :  { %v146_v43 = vmul.f32 %v145_v41, %v128_v21  ;;  %359 = vrcp.f32 %v109_v42  ;;  %v135_v49 = vmul.f32 %v134_v45, %v128_v21  ;;  %v121_v62 = vand.u32 2147483648, %v109_v42  ;;  %v244_v45 = vld [vmem:[%s554_s5 + $0x30] sm:$0xff] }
  0xac   :  { %vm115_vm2 = vweird.f32 %v109_v42  ;;  %v119_v0 = vand.u32 2147483647, %v109_v42  ;;  %v99_v14 = vmul.f32 %v98_v1, %v469_v9  ;;  %344 = vmatpush.xpose.msk.msra.mxu2 %vm41_vm0, %v244_v45  ;;  %334 = vmatpush.xpose.msk.msra.mxu1 %vm41_vm0, %v244_v45 }
  0xad   :  { %v147_v46 = vadd.f32 0.4994258, %v146_v43  ;;  %v136_v54 = vadd.f32 0.18741608, %v135_v49  ;;  %v122_v7 = vor.u32 1.1754944e-38, %v121_v62  ;;  %v240_v49 = vld [vmem:[%s554_s5 + $0x10] sm:$0xff] }
  0xae   :  { %vm120_vm6 = vcmp.eq.f32.partialorder %v119_v0, 8.507059e+37 }
  0xaf   :  { %v148_v47 = vmul.f32 %v147_v46, %v128_v21  ;;  %v137_v59 = vmul.f32 %v136_v54, %v128_v21  ;;  %v243_v46 = vld [vmem:[%s554_s5 + $0x28] sm:$0xff]  ;;  %v238_v54 = vld [vmem:[%s554_s5] sm:$0xff] }
  0xb0   :  { %345 = vmatpush.xpose.msk.msra.mxu2 %vm41_vm0, %v243_v46  ;;  %335 = vmatpush.xpose.msk.msra.mxu1 %vm41_vm0, %v243_v46 }
  0xb1   :  { %v149_v50 = vadd.f32 1.0, %v148_v47  ;;  %v360_v51 = vpop.eup %359  ;;  %v138_v2 = vadd.f32 1.1283791, %v137_v59  ;;  %v242_v47 = vld [vmem:[%s554_s5 + $0x20] sm:$0xff] }
  0xb2   :  { %v111_v52 = vmul.f32 %v360_v51, %v109_v42  ;;  %vm116_vm1 = vweird.f32 %v360_v51 }
  0xb3   :  { %361 = vrcp.f32 %v149_v50  ;;  %v161_v3 = vand.u32 2147483648, %v149_v50  ;;  %vm117_vm3 = vmor %vm115_vm2, %vm116_vm1  ;;  %v159_v5 = vand.u32 2147483647, %v149_v50  ;;  %vm155_vm5 = vweird.f32 %v149_v50 }
  0xb4   :  { %v112_v55 = vsub.f32 1.0, %v111_v52  ;;  %v139_v15 = vmul.f32 %v138_v2, %v476_v16  ;;  %363 = vrcp.f32 %v395_v29  ;;  %346 = vmatpush.xpose.msk.msra.mxu2 %vm41_vm0, %v242_v47  ;;  %336 = vmatpush.xpose.msk.msra.mxu1 %vm41_vm0, %v242_v47  ;;  %v356_v2 = vld [vmem:[%s552_s3] ss:$0 sm:$0xff]  ;;  %vm304_vm1 = vcmask 523264  }
  0xb5   :  { %v162_v11 = vor.u32 1.1754944e-38, %v161_v3  ;;  %vm160_vm8 = vcmp.eq.f32.partialorder %v159_v5, 8.507059e+37  ;;  %v357_v5 = vld [vmem:[%s553_s4] ss:$0 sm:$0xff] }
  0xb6   :  { %v113_v56 = vmul.f32 %v360_v51, %v112_v55 }
  0xb8   :  { %v114_v61 = vadd.f32 %v360_v51, %v113_v56  ;;  %347 = vmatpush.xpose.msk.msra.mxu2 %vm41_vm0, %v241_v48  ;;  %337 = vmatpush.xpose.msk.msra.mxu1 %vm41_vm0, %v241_v48 }
  0xb9   :  { %v362_v57 = vpop.eup %361 }
  0xba   :  { %v151_v60 = vmul.f32 %v362_v57, %v149_v50  ;;  %vm156_vm4 = vweird.f32 %v362_v57  ;;  %v118_v6 = vsel %vm117_vm3, %v360_v51, %v114_v61  ;;  %v364_v30 = vpop.eup %363  ;;  %v239_v50 = vld [vmem:[%s554_s5 + $0x8] sm:$0xff] }
  0xbb   :  { %vm157_vm7 = vmor %vm155_vm5, %vm156_vm4  ;;  %v123_v12 = vsel %vm120_vm6, %v122_v7, %v118_v6  ;;  %v178_v31 = vmul.f32 32.0, %v364_v30  ;;  %vm182_vm9 = vweird.f32 %v364_v30 }
  0xbc   :  { %v152_v63 = vsub.f32 1.0, %v151_v60  ;;  %v124_v20 = vmul.f32 %v123_v12, %v99_v14  ;;  %348 = vmatpush.xpose.msk.msra.mxu2 %vm41_vm0, %v240_v49  ;;  %338 = vmatpush.xpose.msk.msra.mxu1 %vm41_vm0, %v240_v49 }
  0xbd   :  { %v179_v32 = vsub.f32 1.0, %v178_v31 }
  0xbe   :  { %v153_v4 = vmul.f32 %v362_v57, %v152_v63  ;;  %v331_v24 = vclamps-f32 %v124_v20, 1.0 }
  0xbf   :  { %v180_v33 = vmul.f32 %v364_v30, %v179_v32 }
  0xc0   :  { %v154_v10 = vadd.f32 %v362_v57, %v153_v4  ;;  %v167_v27 = vadd.f32 1.0, %v331_v24  ;;  %349 = vmatpush.xpose.msk.msra.mxu2 %vm41_vm0, %v239_v50  ;;  %339 = vmatpush.xpose.msk.msra.mxu1 %vm41_vm0, %v239_v50 }
  0xc1   :  { %v181_v13 = vadd.f32 %v364_v30, %v180_v33 }
  0xc2   :  { %v158_v17 = vsel %vm157_vm7, %v362_v57, %v154_v10  ;;  %v169_v9 = vmul.f32 %v167_v27, %v83_v28 }
  0xc3   :  { %v163_v18 = vsel %vm160_vm8, %v162_v11, %v158_v17  ;;  %v183_v34 = vsel %vm182_vm9, %v364_v30, %v181_v13 }
  0xc4   :  { %v164_v19 = vmul.f32 %v163_v18, %v139_v15  ;;  %v171_v16 = vsel %vm41_vm0, %v169_v9, 0.0  ;;  %350 = vmatpush.xpose.msk.msra.mxu2 %vm41_vm0, %v238_v54  ;;  %340 = vmatpush.xpose.msk.msra.mxu1 %vm41_vm0, %v238_v54 }
  0xc6   :  { %v332_v21 = vclamps-f32 %v164_v19, 1.0 }
  0xc8   :  { %v168_v23 = vadd.f32 1.0, %v332_v21 }
  0xca   :  { %v170_v25 = vmul.f32 %v168_v23, %v84_v22  ;;  %v358_v22 = vld [vmem:[%s555_s6] ss:$0 sm:$0xff] }
  0xcc   :  { %v174_v26 = vsel %vm41_vm0, %v170_v25, 0.0 }
  0xcd   :  { %175 = vadd.xlane.f32.xlu0 %v174_v26 }
  0xd5   :  { %172 = vadd.xlane.f32.xlu0 %v171_v16 }
 0x140   :  { %v176_v35 = vpop.xlane.xlu0 %175 }
 0x141   :  { %v185_v36 = vmul.f32 %v183_v34, %v176_v35 }
 0x143   :  { %v187_v37 = vsub.f32 %v170_v25, %v185_v36 }
 0x145   :  { %v189_v38 = vmul.f32 %v187_v37, %v187_v37 }
 0x147   :  { %v193_v39 = vsel %vm41_vm0, %v189_v38, 0.0 }
 0x148   :  { %194 = vadd.xlane.f32.xlu1 %v193_v39  ;;  %v173_v8 = vpop.xlane.xlu0 %172 }
 0x149   :  { %v184_v40 = vmul.f32 %v183_v34, %v173_v8 }
 0x14b   :  { %v487_v41 = vsub.f32 %v169_v9, %v184_v40 }
 0x14d   :  { %v188_v42 = vmul.f32 %v487_v41, %v487_v41 }
 0x14f   :  { %v190_v43 = vsel %vm41_vm0, %v188_v42, 0.0 }
 0x150   :  { %191 = vadd.xlane.f32.xlu1 %v190_v43 }
 0x1bb   :  { %v195_v51 = vpop.xlane.xlu1 %194 }
 0x1bc   :  { %v197_v52 = vmul.f32 %v195_v51, %v183_v34 }
 0x1be   :  { %v199_v53 = vadd.f32 1e-12, %v197_v52 }
 0x1c0   :  { %365 = vrsqrt.f32 %v199_v53  ;;  %vm216_vm11 = vweird.f32 %v199_v53 }
 0x1c3   :  { %v192_v55 = vpop.xlane.xlu1 %191 }
 0x1c4   :  { %v196_v56 = vmul.f32 %v192_v55, %v183_v34 }
 0x1c6   :  { %v366_v57 = vpop.eup %365  ;;  %v198_v58 = vadd.f32 1e-12, %v196_v56 }
 0x1c7   :  { %v211_v59 = vmul.f32 %v366_v57, %v199_v53  ;;  %vm217_vm10 = vweird.f32 %v366_v57 }
 0x1c8   :  { %367 = vrsqrt.f32 %v198_v58  ;;  %vm218_vm12 = vmor %vm216_vm11, %vm217_vm10  ;;  %vm206_vm14 = vweird.f32 %v198_v58 }
 0x1c9   :  { %v212_v60 = vmul.f32 %v366_v57, %v211_v59 }
 0x1cb   :  { %v213_v61 = vmul.f32 0.5, %v212_v60 }
 0x1cd   :  { %v214_v62 = vsub.f32 1.5, %v213_v61 }
 0x1ce   :  { %v368_v63 = vpop.eup %367 }
 0x1cf   :  { %v215_v0 = vmul.f32 %v366_v57, %v214_v62  ;;  %v201_v1 = vmul.f32 %v368_v63, %v198_v58  ;;  %vm207_vm13 = vweird.f32 %v368_v63 }
 0x1d0   :  { %vm208_vm15 = vmor %vm206_vm14, %vm207_vm13 }
 0x1d1   :  { %v219_v3 = vsel %vm218_vm12, %v366_v57, %v215_v0  ;;  %v202_v4 = vmul.f32 %v368_v63, %v201_v1 }
 0x1d2   :  { %v221_v6 = vmul.f32 %v219_v3, %v187_v37 }
 0x1d3   :  { %v203_v7 = vmul.f32 0.5, %v202_v4 }
 0x1d4   :  { %v227_v10 = vmul.f32 %v356_v2, %v221_v6 }
 0x1d5   :  { %v204_v11 = vsub.f32 1.5, %v203_v7 }
 0x1d6   :  { %v233_v12 = vadd.f32 %v357_v5, %v227_v10 }
 0x1d7   :  { %v205_v14 = vmul.f32 %v368_v63, %v204_v11 }
 0x1d8   :  { %235 = vst.msk [vmem:[#allocation2 + $0x8] sm:$0xff] %vm41_vm0, %v233_v12 }
 0x1d9   :  { %v209_v15 = vsel %vm208_vm15, %v368_v63, %v205_v14 }
 0x1da   :  { %v220_v17 = vmul.f32 %v209_v15, %v487_v41 }
 0x1dc   :  { %v226_v18 = vmul.f32 %v356_v2, %v220_v17 }
 0x1de   :  { %v232_v19 = vadd.f32 %v357_v5, %v226_v18 }
 0x1df   :  { %v237_v20 = vld [vmem:[#allocation2 + $0x8] sm:$0xff] }
 0x1e0   :  { %234 = vst.msk [vmem:[#allocation2] sm:$0xff] %vm41_vm0, %v232_v19  ;;  %342 = vmatmul.msk.f32.vlgmr.msra.gmra.mxu2 %vm41_vm0, %v237_v20 }
 0x1e7   :  { %v236_v21 = vld [vmem:[#allocation2] sm:$0xff] }
 0x1e8   :  { %341 = vmatmul.msk.f32.vlgmr.msra.gmra.mxu1 %vm41_vm0, %v236_v21 }
 0x263   :  { %v301_v23 = vpop.f32.mrf.mxu2 }
 0x264   :  { %v302_v24 = vadd.f32 %v358_v22, %v301_v23 }
 0x265   :  { %v298_v25 = vpop.f32.mrf.mxu1 }
 0x266   :  { %306 = vst.msk [vmem:[#allocation3 + $0x8] sm:$0xff] %vm304_vm1, %v302_v24  ;;  %v299_v26 = vadd.f32 %v358_v22, %v298_v25 }
 0x268   :  { %305 = vst.msk [vmem:[#allocation3] sm:$0xff] %vm304_vm1, %v299_v26 }
 0x269   :  { %319 = dma.vmem_to_hbm [thread:$0]  %s312_s9, 256, %s314_s12, [#allocation4], %s397_s13, %s397_s13, %s398_s14  }
 0x26a   :  { %393 = dma.done.wait [#allocation4], 256  }
 0x26b   :  { %394 = vsyncadd [#allocation4], 4294967040 }
 0x26c   :  { %324 = vsyncpa [#allocation4], 1 }

</bundles_post_ra>
